<compile_context>
chip_gen: v5e
topology: v5e:2x2
jax: 0.10.0
libtpu: 0.0.40
codegen_flags: <defaults>
</compile_context>

<pallas_src>
import functools
import math

import jax
import jax.numpy as jnp
from jax.experimental import pallas as pl
from jax.experimental.pallas import tpu as pltpu


# ---------------------------------------------------------------------------
# tiling helpers (hardened: always (16, 128)-aligned or full-dim blocks)
# ---------------------------------------------------------------------------

def _round_up(x, m):
    return ((x + m - 1) // m) * m


def _choose_tile(dim, target, align):
    """Return (tile, padded_dim).  tile is a multiple of `align`; padded_dim is a
    multiple of tile that covers dim.  Prefers 256-multiples (v6e/v7x MXU)."""
    if dim <= target:
        t = _round_up(dim, align)
        return t, t
    dim_a = _round_up(dim, align)
    for step in (256, 128, align):
        if step % align != 0:
            continue
        t = (target // step) * step
        while t >= step:
            if dim_a % t == 0:
                return t, dim_a
            t -= step
    return target, _round_up(dim, target)


def _attn_q_tile(seq_len, max_tq=256):
    """Largest q-tile <= max_tq that divides seq_len and is a multiple of 8."""
    if seq_len <= max_tq:
        return seq_len
    for t in range(max_tq - (max_tq % 8), 7, -8):
        if seq_len % t == 0:
            return t
    return seq_len


# ---------------------------------------------------------------------------
# Pallas kernels
# ---------------------------------------------------------------------------

def _linear_kernel(x_ref, w_ref, b_ref, o_ref, acc_ref, *, activation):
    # Tiled GEMM: o[i, j] = act(sum_k x[i, k] @ w[k, j] + b[j])
    k = pl.program_id(2)

    @pl.when(k == 0)
    def _():
        acc_ref[...] = jnp.zeros_like(acc_ref)

    acc_ref[...] += jnp.dot(x_ref[...], w_ref[...],
                            preferred_element_type=jnp.float32)

    @pl.when(k == pl.num_programs(2) - 1)
    def _():
        out = acc_ref[...] + b_ref[...]
        if activation == "gelu":
            # tanh GELU -> EUP slot.  TODO(synk): torch default is exact erf.
            out = jax.nn.gelu(out, approximate=True)
        o_ref[...] = out.astype(o_ref.dtype)


def _linear_residual_ln_kernel(x_ref, w_ref, b_ref, res_ref, g_ref, beta_ref,
                               o_ref, acc_ref, *, eps):
    # Tiled GEMM with fused epilogue: o = LayerNorm(res + (x @ w + b))
    # N (== d_model) kept whole so the LN row reduction stays in-block.
    k = pl.program_id(1)

    @pl.when(k == 0)
    def _():
        acc_ref[...] = jnp.zeros_like(acc_ref)

    acc_ref[...] += jnp.dot(x_ref[...], w_ref[...],
                            preferred_element_type=jnp.float32)

    @pl.when(k == pl.num_programs(1) - 1)
    def _():
        z = acc_ref[...] + b_ref[...] + res_ref[...].astype(jnp.float32)
        mean = jnp.mean(z, axis=-1, keepdims=True)
        var = jnp.mean(jnp.square(z - mean), axis=-1, keepdims=True)
        zhat = (z - mean) * jax.lax.rsqrt(var + eps)
        o_ref[...] = (zhat * g_ref[...] + beta_ref[...]).astype(o_ref.dtype)


def _mha_kernel(q_ref, k_ref, v_ref, o_ref):
    # One (batch, head, q-tile) per grid step.  Scale is pre-folded into wq.
    q = q_ref[0, 0, 0]                                   # [tq, dk] bf16
    k = k_ref[0, 0, 0]                                   # [S,  dk] bf16
    v = v_ref[0, 0, 0]                                   # [S,  dk] bf16
    # scores without materializing k.T: contract the dk axis directly.
    s = jax.lax.dot_general(q, k, (((1,), (1,)), ((), ())),
                            preferred_element_type=jnp.float32)   # [tq, S]
    s = s - jnp.max(s, axis=-1, keepdims=True)           # stable softmax
    p = jnp.exp(s)
    l = jnp.sum(p, axis=-1, keepdims=True)                # [tq, 1]
    p = p * (1.0 / l)                                     # exact; divide is tiny
    o = jnp.dot(p.astype(v.dtype), v, preferred_element_type=jnp.float32)
    o_ref[0, 0] = o.astype(o_ref.dtype)


# ---------------------------------------------------------------------------
# pallas_call wrappers
# ---------------------------------------------------------------------------

_VMEM_LIMIT = 32 * 1024 * 1024


def linear(x, w, b, *, activation=None, out_dtype=jnp.bfloat16,
           tm=512, tn=512, tk=512):
    M, K = x.shape
    _, N = w.shape
    tm, Mp = _choose_tile(M, tm, 16)
    tn, Np = _choose_tile(N, tn, 128)
    tk, Kp = _choose_tile(K, tk, 128)

    x = x.astype(jnp.bfloat16)
    w = w.astype(jnp.bfloat16)              # no-op: weights prepared in bf16
    b = jnp.asarray(b, jnp.float32).reshape(1, N)
    if (Mp, Kp) != (M, K):
        x = jnp.pad(x, ((0, Mp - M), (0, Kp - K)))
    if (Kp, Np) != (K, N):
        w = jnp.pad(w, ((0, Kp - K), (0, Np - N)))
    if Np != N:
        b = jnp.pad(b, ((0, 0), (0, Np - N)))

    grid = (Mp // tm, Np // tn, Kp // tk)
    out = pl.pallas_call(
        functools.partial(_linear_kernel, activation=activation),
        grid=grid,
        in_specs=[
            pl.BlockSpec((tm, tk), lambda i, j, k: (i, k)),
            pl.BlockSpec((tk, tn), lambda i, j, k: (k, j)),
            pl.BlockSpec((1, tn), lambda i, j, k: (0, j)),
        ],
        out_specs=pl.BlockSpec((tm, tn), lambda i, j, k: (i, j)),
        out_shape=jax.ShapeDtypeStruct((Mp, Np), out_dtype),
        scratch_shapes=[pltpu.VMEM((tm, tn), jnp.float32)],
        compiler_params=pltpu.CompilerParams(
            dimension_semantics=("parallel", "parallel", "arbitrary"),
            vmem_limit_bytes=_VMEM_LIMIT),
    )(x, w, b)
    if (Mp, Np) != (M, N):
        out = out[:M, :N]
    return out


def linear_residual_ln(x, w, b, res, gamma, beta, *, eps=1e-5,
                       out_dtype=jnp.bfloat16, tm=256, tk=512):
    M, K = x.shape
    _, N = w.shape                  # N == d_model, kept whole for LN reduction
    tm, Mp = _choose_tile(M, tm, 16)
    tk, Kp = _choose_tile(K, tk, 128)

    x = x.astype(jnp.bfloat16)
    w = w.astype(jnp.bfloat16)
    res = res.astype(jnp.bfloat16)
    b = jnp.asarray(b, jnp.float32).reshape(1, N)
    gamma = jnp.asarray(gamma, jnp.float32).reshape(1, N)
    beta = jnp.asarray(beta, jnp.float32).reshape(1, N)
    if (Mp, Kp) != (M, K):
        x = jnp.pad(x, ((0, Mp - M), (0, Kp - K)))
    if Kp != K:
        w = jnp.pad(w, ((0, Kp - K), (0, 0)))
    if Mp != M:
        res = jnp.pad(res, ((0, Mp - M), (0, 0)))

    grid = (Mp // tm, Kp // tk)
    out = pl.pallas_call(
        functools.partial(_linear_residual_ln_kernel, eps=eps),
        grid=grid,
        in_specs=[
            pl.BlockSpec((tm, tk), lambda i, k: (i, k)),
            pl.BlockSpec((tk, N), lambda i, k: (k, 0)),
            pl.BlockSpec((1, N), lambda i, k: (0, 0)),
            pl.BlockSpec((tm, N), lambda i, k: (i, 0)),
            pl.BlockSpec((1, N), lambda i, k: (0, 0)),
            pl.BlockSpec((1, N), lambda i, k: (0, 0)),
        ],
        out_specs=pl.BlockSpec((tm, N), lambda i, k: (i, 0)),
        out_shape=jax.ShapeDtypeStruct((Mp, N), out_dtype),
        scratch_shapes=[pltpu.VMEM((tm, N), jnp.float32)],
        compiler_params=pltpu.CompilerParams(
            dimension_semantics=("parallel", "arbitrary"),
            vmem_limit_bytes=_VMEM_LIMIT),
    )(x, w, b, res, gamma, beta)
    if Mp != M:
        out = out[:M]
    return out


def mha_core(qkv, n_heads, d_model, *, max_tq=256):
    # qkv: [B, 3, H, S, dk] bf16 (scale folded into q) -> [B, H, S, dk] bf16
    B, _, H, S, dk = qkv.shape
    tq = _attn_q_tile(S, max_tq)
    grid = (B, H, S // tq)
    return pl.pallas_call(
        _mha_kernel,
        grid=grid,
        in_specs=[
            pl.BlockSpec((1, 1, 1, tq, dk), lambda b, h, qi: (b, 0, h, qi, 0)),
            pl.BlockSpec((1, 1, 1, S, dk), lambda b, h, qi: (b, 1, h, 0, 0)),
            pl.BlockSpec((1, 1, 1, S, dk), lambda b, h, qi: (b, 2, h, 0, 0)),
        ],
        out_specs=pl.BlockSpec((1, 1, tq, dk), lambda b, h, qi: (b, h, qi, 0)),
        out_shape=jax.ShapeDtypeStruct((B, H, S, dk), jnp.bfloat16),
        compiler_params=pltpu.CompilerParams(
            dimension_semantics=("parallel", "parallel", "parallel")),
    )(qkv, qkv, qkv)


# ---------------------------------------------------------------------------
# Model forward (glue in plain JAX, compute in Pallas kernels)
# ---------------------------------------------------------------------------

def transformer_layer(x, p, n_heads):
    B, S, D = x.shape
    H = n_heads
    dk = D // H
    xf = x.reshape(B * S, D)                               # bf16 activations

    # fused QKV projection (single GEMM, weight prebuilt in bf16 at prepare time)
    qkv = linear(xf, p["wqkv"], p["bqkv"])                 # [B*S, 3D] bf16
    # head-major layout so every attention block is a lane-dense full-dk slab
    qkv = qkv.reshape(B, S, 3, H, dk).transpose(0, 2, 3, 1, 4)   # [B,3,H,S,dk]

    attn = mha_core(qkv, H, D)                             # [B, H, S, dk]
    attn = attn.transpose(0, 2, 1, 3).reshape(B * S, D)    # [B*S, D]

    # out_proj GEMM with fused bias + residual + LayerNorm (norm1)
    x1 = linear_residual_ln(attn, p["wo"], p["bo"], xf, p["ln1_g"], p["ln1_b"])

    # MLP: linear1 + GELU fused, then linear2 with fused residual + LayerNorm
    h = linear(x1, p["w1"], p["b1"], activation="gelu")
    x2 = linear_residual_ln(h, p["w2"], p["b2"], x1, p["ln2_g"], p["ln2_b"])
    return x2.reshape(B, S, D)


def interpretable_transformer_forward(tokens, params, n_heads):
    # TODO(synk): optional padding `mask` argument not implemented.
    B, S = tokens.shape
    D = params["token_emb"].shape[1]
    x = params["token_emb"][tokens] + params["pos_emb"][:, :S, :]
    x = x.astype(jnp.bfloat16)
    for layer_p in params["layers"]:
        x = transformer_layer(x, layer_p, n_heads)
    logits = linear(x.reshape(B * S, D), params["w_out"], params["b_out"],
                    out_dtype=jnp.float32)
    return logits.reshape(B, S, -1)


# ---------------------------------------------------------------------------
# Parameter init (xavier_uniform for dim>1, like the module) + one-time prep
# ---------------------------------------------------------------------------

def _xavier(key, fan_in, fan_out, shape):
    limit = math.sqrt(6.0 / (fan_in + fan_out))
    return jax.random.uniform(key, shape, jnp.float32, -limit, limit)


def init_params(key, vocab_size, d_model, n_heads, n_layers, d_ff, max_seq_len):
    keys = jax.random.split(key, 4 + 6 * n_layers)
    ki = iter(keys)
    params = {
        "token_emb": _xavier(next(ki), vocab_size, d_model, (vocab_size, d_model)),
        "pos_emb": _xavier(next(ki), max_seq_len * d_model, d_model,
                           (1, max_seq_len, d_model)),
        "w_out": _xavier(next(ki), d_model, vocab_size, (d_model, vocab_size)),
        "b_out": jnp.zeros((vocab_size,), jnp.float32),
        "layers": [],
    }
    for _ in range(n_layers):
        layer = {
            "wq": _xavier(next(ki), d_model, d_model, (d_model, d_model)),
            "wk": _xavier(next(ki), d_model, d_model, (d_model, d_model)),
            "wv": _xavier(next(ki), d_model, d_model, (d_model, d_model)),
            "wo": _xavier(next(ki), d_model, d_model, (d_model, d_model)),
            "bq": jnp.zeros((d_model,), jnp.float32),
            "bk": jnp.zeros((d_model,), jnp.float32),
            "bv": jnp.zeros((d_model,), jnp.float32),
            "bo": jnp.zeros((d_model,), jnp.float32),
            "w1": _xavier(next(ki), d_model, d_ff, (d_model, d_ff)),
            "b1": jnp.zeros((d_ff,), jnp.float32),
            "w2": _xavier(next(ki), d_ff, d_model, (d_ff, d_model)),
            "b2": jnp.zeros((d_model,), jnp.float32),
            "ln1_g": jnp.ones((d_model,), jnp.float32),
            "ln1_b": jnp.zeros((d_model,), jnp.float32),
            "ln2_g": jnp.ones((d_model,), jnp.float32),
            "ln2_b": jnp.zeros((d_model,), jnp.float32),
        }
        params["layers"].append(layer)
    return params


def prepare_params(params, n_heads):
    """One-time inference prep: fuse Q|K|V, fold 1/sqrt(dk) into q, cast weights
    to bf16, reshape biases/LN params to (1, N) f32.  Done ONCE, not per forward."""
    d_model = params["token_emb"].shape[1]
    scale = 1.0 / math.sqrt(d_model // n_heads)
    prepped = {
        "token_emb": params["token_emb"].astype(jnp.float32),
        "pos_emb": params["pos_emb"].astype(jnp.float32),
        "w_out": params["w_out"].astype(jnp.bfloat16),
        "b_out": params["b_out"].reshape(1, -1).astype(jnp.float32),
        "layers": [],
    }
    for p in params["layers"]:
        wqkv = jnp.concatenate([p["wq"] * scale, p["wk"], p["wv"]], axis=1)
        bqkv = jnp.concatenate([p["bq"] * scale, p["bk"], p["bv"]], axis=0)
        prepped["layers"].append({
            "wqkv": wqkv.astype(jnp.bfloat16),
            "bqkv": bqkv.reshape(1, -1).astype(jnp.float32),
            "wo": p["wo"].astype(jnp.bfloat16),
            "bo": p["bo"].reshape(1, -1).astype(jnp.float32),
            "w1": p["w1"].astype(jnp.bfloat16),
            "b1": p["b1"].reshape(1, -1).astype(jnp.float32),
            "w2": p["w2"].astype(jnp.bfloat16),
            "b2": p["b2"].reshape(1, -1).astype(jnp.float32),
            "ln1_g": p["ln1_g"].reshape(1, -1).astype(jnp.float32),
            "ln1_b": p["ln1_b"].reshape(1, -1).astype(jnp.float32),
            "ln2_g": p["ln2_g"].reshape(1, -1).astype(jnp.float32),
            "ln2_b": p["ln2_b"].reshape(1, -1).astype(jnp.float32),
        })
    return prepped


# ---------------------------------------------------------------------------
# Demo
# ---------------------------------------------------------------------------

if __name__ == "__main__":
    vocab_size, d_model, n_heads, n_layers, d_ff, max_seq_len = 64, 32, 4, 2, 64, 16
    B, S = 2, 8

    key = jax.random.PRNGKey(0)
    pkey, tkey = jax.random.split(key)
    raw_params = init_params(pkey, vocab_size, d_model, n_heads, n_layers, d_ff,
                             max_seq_len)
    params = prepare_params(raw_params, n_heads)       # one-time fuse/cast
    tokens = jax.random.randint(tkey, (B, S), 0, vocab_size, dtype=jnp.int32)

    fwd = jax.jit(functools.partial(interpretable_transformer_forward,
                                    n_heads=n_heads))
    logits = fwd(tokens, params)
    jax.block_until_ready(logits)

    assert logits.shape == (B, S, vocab_size)
    assert logits.dtype == jnp.float32
    assert bool(jnp.all(jnp.isfinite(logits)))
    print("KERNEL_OK")
</pallas_src>

<mosaic_0001>
module attributes {stable_mosaic.version = 11 : i64} {
  func.func @_linear_kernel(%arg0: i32, %arg1: i32, %arg2: i32, %arg3: memref<16x128xbf16, #tpu.memory_space<vmem>>, %arg4: memref<128x128xbf16, #tpu.memory_space<vmem>>, %arg5: memref<1x128xf32, #tpu.memory_space<vmem>>, %arg6: memref<16x128xbf16, #tpu.memory_space<vmem>>, %arg7: memref<16x128xf32, #tpu.memory_space<vmem>>) attributes {dimension_semantics = [#tpu.dimension_semantics<parallel>, #tpu.dimension_semantics<parallel>, #tpu.dimension_semantics<arbitrary>], iteration_bounds = array<i64: 1, 1, 1>, scalar_prefetch = 0 : i64, scratch_operands = 1 : i64, tpu.core_type = #tpu.core_type<tc>, window_params = [{transform_indices = @transform_0, window_bounds = array<i64: 16, 128>}, {transform_indices = @transform_1, window_bounds = array<i64: 128, 128>}, {transform_indices = @transform_2, window_bounds = array<i64: 1, 128>}, {transform_indices = @transform_3, window_bounds = array<i64: 16, 128>}]} {
    %c0_i32 = arith.constant 0 : i32
    %0 = arith.cmpi eq, %arg2, %c0_i32 : i32
    %1 = arith.extui %0 : i1 to i32
    %c0_i32_0 = arith.constant 0 : i32
    %2 = arith.cmpi ne, %1, %c0_i32_0 : i32
    scf.if %2 {
      %cst_10 = arith.constant 0.000000e+00 : f32
      %12 = vector.broadcast %cst_10 : f32 to vector<16x128xf32>
      %c0_11 = arith.constant 0 : index
      %c0_12 = arith.constant 0 : index
      %13 = vector.load %arg7[%c0_11, %c0_12] : memref<16x128xf32, #tpu.memory_space<vmem>>, vector<16x128xf32>
      tpu.vector_store %arg7[%c0_11, %c0_12], %12 {strides = array<i32>} : memref<16x128xf32, #tpu.memory_space<vmem>>, vector<16x128xf32>,
    } else {
    }
    %c0 = arith.constant 0 : index
    %c0_1 = arith.constant 0 : index
    %3 = vector.load %arg7[%c0, %c0_1] : memref<16x128xf32, #tpu.memory_space<vmem>>, vector<16x128xf32>
    %c0_2 = arith.constant 0 : index
    %c0_3 = arith.constant 0 : index
    %4 = vector.load %arg3[%c0_2, %c0_3] : memref<16x128xbf16, #tpu.memory_space<vmem>>, vector<16x128xbf16>
    %c0_4 = arith.constant 0 : index
    %c0_5 = arith.constant 0 : index
    %5 = vector.load %arg4[%c0_4, %c0_5] : memref<128x128xbf16, #tpu.memory_space<vmem>>, vector<128x128xbf16>
    %cst = arith.constant dense<0.000000e+00> : vector<16x128xf32>
    %6 = tpu.matmul %4, %5, %cst {dimension_numbers = #tpu.dot_dimension_numbers<[1], [0], [0], [1], [0, 0, 1, 1], [], []>} : vector<16x128xbf16>, vector<128x128xbf16>, vector<16x128xf32> -> vector<16x128xf32>
    %7 = arith.addf %3, %6 : vector<16x128xf32>
    %c0_6 = arith.constant 0 : index
    %c0_7 = arith.constant 0 : index
    %8 = vector.load %arg7[%c0_6, %c0_7] : memref<16x128xf32, #tpu.memory_space<vmem>>, vector<16x128xf32>
    tpu.vector_store %arg7[%c0_6, %c0_7], %7 {strides = array<i32>} : memref<16x128xf32, #tpu.memory_space<vmem>>, vector<16x128xf32>,
    %c0_i32_8 = arith.constant 0 : i32
    %9 = arith.cmpi eq, %arg2, %c0_i32_8 : i32
    %10 = arith.extui %9 : i1 to i32
    %c0_i32_9 = arith.constant 0 : i32
    %11 = arith.cmpi ne, %10, %c0_i32_9 : i32
    scf.if %11 {
      %c0_10 = arith.constant 0 : index
      %c0_11 = arith.constant 0 : index
      %12 = vector.load %arg7[%c0_10, %c0_11] : memref<16x128xf32, #tpu.memory_space<vmem>>, vector<16x128xf32>
      %c0_12 = arith.constant 0 : index
      %c0_13 = arith.constant 0 : index
      %13 = vector.load %arg5[%c0_12, %c0_13] : memref<1x128xf32, #tpu.memory_space<vmem>>, vector<1x128xf32>
      %14 = vector.broadcast %13 : vector<1x128xf32> to vector<16x128xf32>
      %15 = arith.addf %12, %14 : vector<16x128xf32>
      %16 = arith.truncf %15 : vector<16x128xf32> to vector<16x128xbf16>
      %c0_14 = arith.constant 0 : index
      %c0_15 = arith.constant 0 : index
      %17 = vector.load %arg6[%c0_14, %c0_15] : memref<16x128xbf16, #tpu.memory_space<vmem>>, vector<16x128xbf16>
      tpu.vector_store %arg6[%c0_14, %c0_15], %16 {strides = array<i32>} : memref<16x128xbf16, #tpu.memory_space<vmem>>, vector<16x128xbf16>,
    } else {
    }
    return
  }
  func.func @transform_0(%arg0: i32, %arg1: i32, %arg2: i32) -> (i32, i32) {
    %c0_i32 = arith.constant 0 : i32
    return %arg0, %arg2 : i32, i32
  }
  func.func @transform_1(%arg0: i32, %arg1: i32, %arg2: i32) -> (i32, i32) {
    %c0_i32 = arith.constant 0 : i32
    return %arg2, %arg1 : i32, i32
  }
  func.func @transform_2(%arg0: i32, %arg1: i32, %arg2: i32) -> (i32, i32) {
    %c0_i32 = arith.constant 0 : i32
    %c0_i32_0 = arith.constant 0 : i32
    return %c0_i32, %arg1 : i32, i32
  }
  func.func @transform_3(%arg0: i32, %arg1: i32, %arg2: i32) -> (i32, i32) {
    %c0_i32 = arith.constant 0 : i32
    return %arg0, %arg1 : i32, i32
  }
}

module attributes {stable_mosaic.version = 11 : i64} {
  func.func @_mha_kernel(%arg0: i32, %arg1: i32, %arg2: i32, %arg3: memref<1x1x1x8x8xbf16, #tpu.memory_space<vmem>>, %arg4: memref<1x1x1x8x8xbf16, #tpu.memory_space<vmem>>, %arg5: memref<1x1x1x8x8xbf16, #tpu.memory_space<vmem>>, %arg6: memref<1x1x8x8xbf16, #tpu.memory_space<vmem>>) attributes {dimension_semantics = [#tpu.dimension_semantics<parallel>, #tpu.dimension_semantics<parallel>, #tpu.dimension_semantics<parallel>], iteration_bounds = array<i64: 2, 4, 1>, scalar_prefetch = 0 : i64, scratch_operands = 0 : i64, tpu.core_type = #tpu.core_type<tc>, window_params = [{transform_indices = @transform_0, window_bounds = array<i64: 1, 1, 1, 8, 8>}, {transform_indices = @transform_1, window_bounds = array<i64: 1, 1, 1, 8, 8>}, {transform_indices = @transform_2, window_bounds = array<i64: 1, 1, 1, 8, 8>}, {transform_indices = @transform_3, window_bounds = array<i64: 1, 1, 8, 8>}]} {
    %c0 = arith.constant 0 : index
    %c0_0 = arith.constant 0 : index
    %c0_1 = arith.constant 0 : index
    %c0_2 = arith.constant 0 : index
    %c0_3 = arith.constant 0 : index
    %0 = vector.load %arg3[%c0, %c0_0, %c0_1, %c0_2, %c0_3] : memref<1x1x1x8x8xbf16, #tpu.memory_space<vmem>>, vector<1x1x1x8x8xbf16>
    %1 = vector.shape_cast %0 : vector<1x1x1x8x8xbf16> to vector<8x8xbf16>
    %c0_4 = arith.constant 0 : index
    %c0_5 = arith.constant 0 : index
    %c0_6 = arith.constant 0 : index
    %c0_7 = arith.constant 0 : index
    %c0_8 = arith.constant 0 : index
    %2 = vector.load %arg4[%c0_4, %c0_5, %c0_6, %c0_7, %c0_8] : memref<1x1x1x8x8xbf16, #tpu.memory_space<vmem>>, vector<1x1x1x8x8xbf16>
    %3 = vector.shape_cast %2 : vector<1x1x1x8x8xbf16> to vector<8x8xbf16>
    %c0_9 = arith.constant 0 : index
    %c0_10 = arith.constant 0 : index
    %c0_11 = arith.constant 0 : index
    %c0_12 = arith.constant 0 : index
    %c0_13 = arith.constant 0 : index
    %4 = vector.load %arg5[%c0_9, %c0_10, %c0_11, %c0_12, %c0_13] : memref<1x1x1x8x8xbf16, #tpu.memory_space<vmem>>, vector<1x1x1x8x8xbf16>
    %5 = vector.shape_cast %4 : vector<1x1x1x8x8xbf16> to vector<8x8xbf16>
    %cst = arith.constant dense<0.000000e+00> : vector<8x8xf32>
    %6 = tpu.matmul %1, %3, %cst {dimension_numbers = #tpu.dot_dimension_numbers<[1], [1], [0], [0], [0, 0, 1, 0], [], []>} : vector<8x8xbf16>, vector<8x8xbf16>, vector<8x8xf32> -> vector<8x8xf32>
    %cst_14 = arith.constant dense<0xFF800000> : vector<8xf32>
    %7 = vector.multi_reduction <maximumf>, %6, %cst_14 [1] : vector<8x8xf32> to vector<8xf32>
    %8 = vector.shape_cast %7 : vector<8xf32> to vector<8x1xf32>
    %9 = vector.broadcast %8 : vector<8x1xf32> to vector<8x8xf32>
    %10 = arith.subf %6, %9 : vector<8x8xf32>
    %11 = math.exp %10 : vector<8x8xf32>
    %cst_15 = arith.constant dense<0.000000e+00> : vector<8xf32>
    %12 = vector.multi_reduction <add>, %11, %cst_15 [1] : vector<8x8xf32> to vector<8xf32>
    %13 = vector.shape_cast %12 : vector<8xf32> to vector<8x1xf32>
    %cst_16 = arith.constant 1.000000e+00 : f32
    %14 = vector.broadcast %cst_16 : f32 to vector<8x1xf32>
    %15 = arith.divf %14, %13 : vector<8x1xf32>
    %16 = vector.broadcast %15 : vector<8x1xf32> to vector<8x8xf32>
    %17 = arith.mulf %11, %16 : vector<8x8xf32>
    %18 = arith.truncf %17 : vector<8x8xf32> to vector<8x8xbf16>
    %cst_17 = arith.constant dense<0.000000e+00> : vector<8x8xf32>
    %19 = tpu.matmul %18, %5, %cst_17 {dimension_numbers = #tpu.dot_dimension_numbers<[1], [0], [0], [1], [0, 0, 1, 1], [], []>} : vector<8x8xbf16>, vector<8x8xbf16>, vector<8x8xf32> -> vector<8x8xf32>
    %20 = arith.truncf %19 : vector<8x8xf32> to vector<8x8xbf16>
    %c0_18 = arith.constant 0 : index
    %c0_19 = arith.constant 0 : index
    %c0_20 = arith.constant 0 : index
    %c0_21 = arith.constant 0 : index
    %21 = vector.load %arg6[%c0_18, %c0_19, %c0_20, %c0_21] : memref<1x1x8x8xbf16, #tpu.memory_space<vmem>>, vector<1x1x8x8xbf16>
    %22 = vector.shape_cast %21 : vector<1x1x8x8xbf16> to vector<8x8xbf16>
    %23 = vector.shape_cast %20 : vector<8x8xbf16> to vector<1x1x8x8xbf16>
    tpu.vector_store %arg6[%c0_18, %c0_19, %c0_20, %c0_21], %23 {strides = array<i32>} : memref<1x1x8x8xbf16, #tpu.memory_space<vmem>>, vector<1x1x8x8xbf16>,
    return
  }
  func.func @transform_0(%arg0: i32, %arg1: i32, %arg2: i32) -> (i32, i32, i32, i32, i32) {
    %c0_i32 = arith.constant 0 : i32
    %c0_i32_0 = arith.constant 0 : i32
    %c0_i32_1 = arith.constant 0 : i32
    return %arg0, %c0_i32, %arg1, %arg2, %c0_i32_0 : i32, i32, i32, i32, i32
  }
  func.func @transform_1(%arg0: i32, %arg1: i32, %arg2: i32) -> (i32, i32, i32, i32, i32) {
    %c1_i32 = arith.constant 1 : i32
    %c0_i32 = arith.constant 0 : i32
    %c0_i32_0 = arith.constant 0 : i32
    %c0_i32_1 = arith.constant 0 : i32
    return %arg0, %c1_i32, %arg1, %c0_i32, %c0_i32_0 : i32, i32, i32, i32, i32
  }
  func.func @transform_2(%arg0: i32, %arg1: i32, %arg2: i32) -> (i32, i32, i32, i32, i32) {
    %c2_i32 = arith.constant 2 : i32
    %c0_i32 = arith.constant 0 : i32
    %c0_i32_0 = arith.constant 0 : i32
    %c0_i32_1 = arith.constant 0 : i32
    return %arg0, %c2_i32, %arg1, %c0_i32, %c0_i32_0 : i32, i32, i32, i32, i32
  }
  func.func @transform_3(%arg0: i32, %arg1: i32, %arg2: i32) -> (i32, i32, i32, i32) {
    %c0_i32 = arith.constant 0 : i32
    %c0_i32_0 = arith.constant 0 : i32
    return %arg0, %arg1, %arg2, %c0_i32 : i32, i32, i32, i32
  }
}

module attributes {stable_mosaic.version = 11 : i64} {
  func.func @_linear_residual_ln_kernel(%arg0: i32, %arg1: i32, %arg2: memref<16x128xbf16, #tpu.memory_space<vmem>>, %arg3: memref<128x32xbf16, #tpu.memory_space<vmem>>, %arg4: memref<1x32xf32, #tpu.memory_space<vmem>>, %arg5: memref<16x32xbf16, #tpu.memory_space<vmem>>, %arg6: memref<1x32xf32, #tpu.memory_space<vmem>>, %arg7: memref<1x32xf32, #tpu.memory_space<vmem>>, %arg8: memref<16x32xbf16, #tpu.memory_space<vmem>>, %arg9: memref<16x32xf32, #tpu.memory_space<vmem>>) attributes {dimension_semantics = [#tpu.dimension_semantics<parallel>, #tpu.dimension_semantics<arbitrary>], iteration_bounds = array<i64: 1, 1>, scalar_prefetch = 0 : i64, scratch_operands = 1 : i64, tpu.core_type = #tpu.core_type<tc>, window_params = [{transform_indices = @transform_0, window_bounds = array<i64: 16, 128>}, {transform_indices = @transform_1, window_bounds = array<i64: 128, 32>}, {pipeline_mode = #tpu.pipeline_mode<synchronous>, transform_indices = @transform_2, window_bounds = array<i64: 1, 32>}, {transform_indices = @transform_3, window_bounds = array<i64: 16, 32>}, {pipeline_mode = #tpu.pipeline_mode<synchronous>, transform_indices = @transform_4, window_bounds = array<i64: 1, 32>}, {pipeline_mode = #tpu.pipeline_mode<synchronous>, transform_indices = @transform_5, window_bounds = array<i64: 1, 32>}, {transform_indices = @transform_6, window_bounds = array<i64: 16, 32>}]} {
    %c0_i32 = arith.constant 0 : i32
    %0 = arith.cmpi eq, %arg1, %c0_i32 : i32
    %1 = arith.extui %0 : i1 to i32
    %c0_i32_0 = arith.constant 0 : i32
    %2 = arith.cmpi ne, %1, %c0_i32_0 : i32
    scf.if %2 {
      %cst_10 = arith.constant 0.000000e+00 : f32
      %12 = vector.broadcast %cst_10 : f32 to vector<16x32xf32>
      %c0_11 = arith.constant 0 : index
      %c0_12 = arith.constant 0 : index
      %13 = vector.load %arg9[%c0_11, %c0_12] : memref<16x32xf32, #tpu.memory_space<vmem>>, vector<16x32xf32>
      tpu.vector_store %arg9[%c0_11, %c0_12], %12 {strides = array<i32>} : memref<16x32xf32, #tpu.memory_space<vmem>>, vector<16x32xf32>,
    } else {
    }
    %c0 = arith.constant 0 : index
    %c0_1 = arith.constant 0 : index
    %3 = vector.load %arg9[%c0, %c0_1] : memref<16x32xf32, #tpu.memory_space<vmem>>, vector<16x32xf32>
    %c0_2 = arith.constant 0 : index
    %c0_3 = arith.constant 0 : index
    %4 = vector.load %arg2[%c0_2, %c0_3] : memref<16x128xbf16, #tpu.memory_space<vmem>>, vector<16x128xbf16>
    %c0_4 = arith.constant 0 : index
    %c0_5 = arith.constant 0 : index
    %5 = vector.load %arg3[%c0_4, %c0_5] : memref<128x32xbf16, #tpu.memory_space<vmem>>, vector<128x32xbf16>
    %cst = arith.constant dense<0.000000e+00> : vector<16x32xf32>
    %6 = tpu.matmul %4, %5, %cst {dimension_numbers = #tpu.dot_dimension_numbers<[1], [0], [0], [1], [0, 0, 1, 1], [], []>} : vector<16x128xbf16>, vector<128x32xbf16>, vector<16x32xf32> -> vector<16x32xf32>
    %7 = arith.addf %3, %6 : vector<16x32xf32>
    %c0_6 = arith.constant 0 : index
    %c0_7 = arith.constant 0 : index
    %8 = vector.load %arg9[%c0_6, %c0_7] : memref<16x32xf32, #tpu.memory_space<vmem>>, vector<16x32xf32>
    tpu.vector_store %arg9[%c0_6, %c0_7], %7 {strides = array<i32>} : memref<16x32xf32, #tpu.memory_space<vmem>>, vector<16x32xf32>,
    %c0_i32_8 = arith.constant 0 : i32
    %9 = arith.cmpi eq, %arg1, %c0_i32_8 : i32
    %10 = arith.extui %9 : i1 to i32
    %c0_i32_9 = arith.constant 0 : i32
    %11 = arith.cmpi ne, %10, %c0_i32_9 : i32
    scf.if %11 {
      %c0_10 = arith.constant 0 : index
      %c0_11 = arith.constant 0 : index
      %12 = vector.load %arg9[%c0_10, %c0_11] : memref<16x32xf32, #tpu.memory_space<vmem>>, vector<16x32xf32>
      %c0_12 = arith.constant 0 : index
      %c0_13 = arith.constant 0 : index
      %13 = vector.load %arg4[%c0_12, %c0_13] : memref<1x32xf32, #tpu.memory_space<vmem>>, vector<1x32xf32>
      %14 = vector.broadcast %13 : vector<1x32xf32> to vector<16x32xf32>
      %15 = arith.addf %12, %14 : vector<16x32xf32>
      %c0_14 = arith.constant 0 : index
      %c0_15 = arith.constant 0 : index
      %16 = vector.load %arg5[%c0_14, %c0_15] : memref<16x32xbf16, #tpu.memory_space<vmem>>, vector<16x32xbf16>
      %17 = arith.extf %16 : vector<16x32xbf16> to vector<16x32xf32>
      %18 = arith.addf %15, %17 : vector<16x32xf32>
      %cst_16 = arith.constant dense<0.000000e+00> : vector<16xf32>
      %19 = vector.multi_reduction <add>, %18, %cst_16 [1] : vector<16x32xf32> to vector<16xf32>
      %20 = vector.shape_cast %19 : vector<16xf32> to vector<16x1xf32>
      %cst_17 = arith.constant 3.200000e+01 : f32
      %21 = vector.broadcast %cst_17 : f32 to vector<16x1xf32>
      %22 = arith.divf %20, %21 : vector<16x1xf32>
      %23 = vector.broadcast %22 : vector<16x1xf32> to vector<16x32xf32>
      %24 = arith.subf %18, %23 : vector<16x32xf32>
      %25 = arith.mulf %24, %24 : vector<16x32xf32>
      %cst_18 = arith.constant dense<0.000000e+00> : vector<16xf32>
      %26 = vector.multi_reduction <add>, %25, %cst_18 [1] : vector<16x32xf32> to vector<16xf32>
      %27 = vector.shape_cast %26 : vector<16xf32> to vector<16x1xf32>
      %cst_19 = arith.constant 3.200000e+01 : f32
      %28 = vector.broadcast %cst_19 : f32 to vector<16x1xf32>
      %29 = arith.divf %27, %28 : vector<16x1xf32>
      %30 = vector.broadcast %22 : vector<16x1xf32> to vector<16x32xf32>
      %31 = arith.subf %18, %30 : vector<16x32xf32>
      %cst_20 = arith.constant 9.99999974E-6 : f32
      %32 = vector.broadcast %cst_20 : f32 to vector<16x1xf32>
      %33 = arith.addf %29, %32 : vector<16x1xf32>
      %34 = math.rsqrt %33 : vector<16x1xf32>
      %35 = vector.broadcast %34 : vector<16x1xf32> to vector<16x32xf32>
      %36 = arith.mulf %31, %35 : vector<16x32xf32>
      %c0_21 = arith.constant 0 : index
      %c0_22 = arith.constant 0 : index
      %37 = vector.load %arg6[%c0_21, %c0_22] : memref<1x32xf32, #tpu.memory_space<vmem>>, vector<1x32xf32>
      %38 = vector.broadcast %37 : vector<1x32xf32> to vector<16x32xf32>
      %39 = arith.mulf %36, %38 : vector<16x32xf32>
      %c0_23 = arith.constant 0 : index
      %c0_24 = arith.constant 0 : index
      %40 = vector.load %arg7[%c0_23, %c0_24] : memref<1x32xf32, #tpu.memory_space<vmem>>, vector<1x32xf32>
      %41 = vector.broadcast %40 : vector<1x32xf32> to vector<16x32xf32>
      %42 = arith.addf %39, %41 : vector<16x32xf32>
      %43 = arith.truncf %42 : vector<16x32xf32> to vector<16x32xbf16>
      %c0_25 = arith.constant 0 : index
      %c0_26 = arith.constant 0 : index
      %44 = vector.load %arg8[%c0_25, %c0_26] : memref<16x32xbf16, #tpu.memory_space<vmem>>, vector<16x32xbf16>
      tpu.vector_store %arg8[%c0_25, %c0_26], %43 {strides = array<i32>} : memref<16x32xbf16, #tpu.memory_space<vmem>>, vector<16x32xbf16>,
    } else {
    }
    return
  }
  func.func @transform_0(%arg0: i32, %arg1: i32) -> (i32, i32) {
    %c0_i32 = arith.constant 0 : i32
    return %arg0, %arg1 : i32, i32
  }
  func.func @transform_1(%arg0: i32, %arg1: i32) -> (i32, i32) {
    %c0_i32 = arith.constant 0 : i32
    %c0_i32_0 = arith.constant 0 : i32
    return %arg1, %c0_i32 : i32, i32
  }
  func.func @transform_2(%arg0: i32, %arg1: i32) -> (i32, i32) {
    %c0_i32 = arith.constant 0 : i32
    %c0_i32_0 = arith.constant 0 : i32
    %c0_i32_1 = arith.constant 0 : i32
    return %c0_i32, %c0_i32_0 : i32, i32
  }
  func.func @transform_3(%arg0: i32, %arg1: i32) -> (i32, i32) {
    %c0_i32 = arith.constant 0 : i32
    %c0_i32_0 = arith.constant 0 : i32
    return %arg0, %c0_i32 : i32, i32
  }
  func.func @transform_4(%arg0: i32, %arg1: i32) -> (i32, i32) {
    %c0_i32 = arith.constant 0 : i32
    %c0_i32_0 = arith.constant 0 : i32
    %c0_i32_1 = arith.constant 0 : i32
    return %c0_i32, %c0_i32_0 : i32, i32
  }
  func.func @transform_5(%arg0: i32, %arg1: i32) -> (i32, i32) {
    %c0_i32 = arith.constant 0 : i32
    %c0_i32_0 = arith.constant 0 : i32
    %c0_i32_1 = arith.constant 0 : i32
    return %c0_i32, %c0_i32_0 : i32, i32
  }
  func.func @transform_6(%arg0: i32, %arg1: i32) -> (i32, i32) {
    %c0_i32 = arith.constant 0 : i32
    %c0_i32_0 = arith.constant 0 : i32
    return %arg0, %c0_i32 : i32, i32
  }
}

module attributes {stable_mosaic.version = 11 : i64} {
  func.func @_linear_kernel(%arg0: i32, %arg1: i32, %arg2: i32, %arg3: memref<16x128xbf16, #tpu.memory_space<vmem>>, %arg4: memref<128x128xbf16, #tpu.memory_space<vmem>>, %arg5: memref<1x128xf32, #tpu.memory_space<vmem>>, %arg6: memref<16x128xbf16, #tpu.memory_space<vmem>>, %arg7: memref<16x128xf32, #tpu.memory_space<vmem>>) attributes {dimension_semantics = [#tpu.dimension_semantics<parallel>, #tpu.dimension_semantics<parallel>, #tpu.dimension_semantics<arbitrary>], iteration_bounds = array<i64: 1, 1, 1>, scalar_prefetch = 0 : i64, scratch_operands = 1 : i64, tpu.core_type = #tpu.core_type<tc>, window_params = [{transform_indices = @transform_0, window_bounds = array<i64: 16, 128>}, {transform_indices = @transform_1, window_bounds = array<i64: 128, 128>}, {transform_indices = @transform_2, window_bounds = array<i64: 1, 128>}, {transform_indices = @transform_3, window_bounds = array<i64: 16, 128>}]} {
    %c0_i32 = arith.constant 0 : i32
    %0 = arith.cmpi eq, %arg2, %c0_i32 : i32
    %1 = arith.extui %0 : i1 to i32
    %c0_i32_0 = arith.constant 0 : i32
    %2 = arith.cmpi ne, %1, %c0_i32_0 : i32
    scf.if %2 {
      %cst_10 = arith.constant 0.000000e+00 : f32
      %12 = vector.broadcast %cst_10 : f32 to vector<16x128xf32>
      %c0_11 = arith.constant 0 : index
      %c0_12 = arith.constant 0 : index
      %13 = vector.load %arg7[%c0_11, %c0_12] : memref<16x128xf32, #tpu.memory_space<vmem>>, vector<16x128xf32>
      tpu.vector_store %arg7[%c0_11, %c0_12], %12 {strides = array<i32>} : memref<16x128xf32, #tpu.memory_space<vmem>>, vector<16x128xf32>,
    } else {
    }
    %c0 = arith.constant 0 : index
    %c0_1 = arith.constant 0 : index
    %3 = vector.load %arg7[%c0, %c0_1] : memref<16x128xf32, #tpu.memory_space<vmem>>, vector<16x128xf32>
    %c0_2 = arith.constant 0 : index
    %c0_3 = arith.constant 0 : index
    %4 = vector.load %arg3[%c0_2, %c0_3] : memref<16x128xbf16, #tpu.memory_space<vmem>>, vector<16x128xbf16>
    %c0_4 = arith.constant 0 : index
    %c0_5 = arith.constant 0 : index
    %5 = vector.load %arg4[%c0_4, %c0_5] : memref<128x128xbf16, #tpu.memory_space<vmem>>, vector<128x128xbf16>
    %cst = arith.constant dense<0.000000e+00> : vector<16x128xf32>
    %6 = tpu.matmul %4, %5, %cst {dimension_numbers = #tpu.dot_dimension_numbers<[1], [0], [0], [1], [0, 0, 1, 1], [], []>} : vector<16x128xbf16>, vector<128x128xbf16>, vector<16x128xf32> -> vector<16x128xf32>
    %7 = arith.addf %3, %6 : vector<16x128xf32>
    %c0_6 = arith.constant 0 : index
    %c0_7 = arith.constant 0 : index
    %8 = vector.load %arg7[%c0_6, %c0_7] : memref<16x128xf32, #tpu.memory_space<vmem>>, vector<16x128xf32>
    tpu.vector_store %arg7[%c0_6, %c0_7], %7 {strides = array<i32>} : memref<16x128xf32, #tpu.memory_space<vmem>>, vector<16x128xf32>,
    %c0_i32_8 = arith.constant 0 : i32
    %9 = arith.cmpi eq, %arg2, %c0_i32_8 : i32
    %10 = arith.extui %9 : i1 to i32
    %c0_i32_9 = arith.constant 0 : i32
    %11 = arith.cmpi ne, %10, %c0_i32_9 : i32
    scf.if %11 {
      %c0_10 = arith.constant 0 : index
      %c0_11 = arith.constant 0 : index
      %12 = vector.load %arg7[%c0_10, %c0_11] : memref<16x128xf32, #tpu.memory_space<vmem>>, vector<16x128xf32>
      %c0_12 = arith.constant 0 : index
      %c0_13 = arith.constant 0 : index
      %13 = vector.load %arg5[%c0_12, %c0_13] : memref<1x128xf32, #tpu.memory_space<vmem>>, vector<1x128xf32>
      %14 = vector.broadcast %13 : vector<1x128xf32> to vector<16x128xf32>
      %15 = arith.addf %12, %14 : vector<16x128xf32>
      %16 = arith.mulf %15, %15 : vector<16x128xf32>
      %17 = arith.mulf %15, %16 : vector<16x128xf32>
      %cst_14 = arith.constant 4.471500e-02 : f32
      %18 = vector.broadcast %cst_14 : f32 to vector<16x128xf32>
      %19 = arith.mulf %18, %17 : vector<16x128xf32>
      %20 = arith.addf %15, %19 : vector<16x128xf32>
      %cst_15 = arith.constant 0.797884583 : f32
      %21 = vector.broadcast %cst_15 : f32 to vector<16x128xf32>
      %22 = arith.mulf %21, %20 : vector<16x128xf32>
      %23 = math.tanh %22 : vector<16x128xf32>
      %cst_16 = arith.constant 1.000000e+00 : f32
      %24 = vector.broadcast %cst_16 : f32 to vector<16x128xf32>
      %25 = arith.addf %24, %23 : vector<16x128xf32>
      %cst_17 = arith.constant 5.000000e-01 : f32
      %26 = vector.broadcast %cst_17 : f32 to vector<16x128xf32>
      %27 = arith.mulf %26, %25 : vector<16x128xf32>
      %28 = arith.mulf %15, %27 : vector<16x128xf32>
      %29 = arith.truncf %28 : vector<16x128xf32> to vector<16x128xbf16>
      %c0_18 = arith.constant 0 : index
      %c0_19 = arith.constant 0 : index
      %30 = vector.load %arg6[%c0_18, %c0_19] : memref<16x128xbf16, #tpu.memory_space<vmem>>, vector<16x128xbf16>
      tpu.vector_store %arg6[%c0_18, %c0_19], %29 {strides = array<i32>} : memref<16x128xbf16, #tpu.memory_space<vmem>>, vector<16x128xbf16>,
    } else {
    }
    return
  }
  func.func @transform_0(%arg0: i32, %arg1: i32, %arg2: i32) -> (i32, i32) {
    %c0_i32 = arith.constant 0 : i32
    return %arg0, %arg2 : i32, i32
  }
  func.func @transform_1(%arg0: i32, %arg1: i32, %arg2: i32) -> (i32, i32) {
    %c0_i32 = arith.constant 0 : i32
    return %arg2, %arg1 : i32, i32
  }
  func.func @transform_2(%arg0: i32, %arg1: i32, %arg2: i32) -> (i32, i32) {
    %c0_i32 = arith.constant 0 : i32
    %c0_i32_0 = arith.constant 0 : i32
    return %c0_i32, %arg1 : i32, i32
  }
  func.func @transform_3(%arg0: i32, %arg1: i32, %arg2: i32) -> (i32, i32) {
    %c0_i32 = arith.constant 0 : i32
    return %arg0, %arg1 : i32, i32
  }
}

module attributes {stable_mosaic.version = 11 : i64} {
  func.func @_linear_kernel(%arg0: i32, %arg1: i32, %arg2: i32, %arg3: memref<16x128xbf16, #tpu.memory_space<vmem>>, %arg4: memref<128x128xbf16, #tpu.memory_space<vmem>>, %arg5: memref<1x128xf32, #tpu.memory_space<vmem>>, %arg6: memref<16x128xf32, #tpu.memory_space<vmem>>, %arg7: memref<16x128xf32, #tpu.memory_space<vmem>>) attributes {dimension_semantics = [#tpu.dimension_semantics<parallel>, #tpu.dimension_semantics<parallel>, #tpu.dimension_semantics<arbitrary>], iteration_bounds = array<i64: 1, 1, 1>, scalar_prefetch = 0 : i64, scratch_operands = 1 : i64, tpu.core_type = #tpu.core_type<tc>, window_params = [{transform_indices = @transform_0, window_bounds = array<i64: 16, 128>}, {transform_indices = @transform_1, window_bounds = array<i64: 128, 128>}, {transform_indices = @transform_2, window_bounds = array<i64: 1, 128>}, {transform_indices = @transform_3, window_bounds = array<i64: 16, 128>}]} {
    %c0_i32 = arith.constant 0 : i32
    %0 = arith.cmpi eq, %arg2, %c0_i32 : i32
    %1 = arith.extui %0 : i1 to i32
    %c0_i32_0 = arith.constant 0 : i32
    %2 = arith.cmpi ne, %1, %c0_i32_0 : i32
    scf.if %2 {
      %cst_10 = arith.constant 0.000000e+00 : f32
      %12 = vector.broadcast %cst_10 : f32 to vector<16x128xf32>
      %c0_11 = arith.constant 0 : index
      %c0_12 = arith.constant 0 : index
      %13 = vector.load %arg7[%c0_11, %c0_12] : memref<16x128xf32, #tpu.memory_space<vmem>>, vector<16x128xf32>
      tpu.vector_store %arg7[%c0_11, %c0_12], %12 {strides = array<i32>} : memref<16x128xf32, #tpu.memory_space<vmem>>, vector<16x128xf32>,
    } else {
    }
    %c0 = arith.constant 0 : index
    %c0_1 = arith.constant 0 : index
    %3 = vector.load %arg7[%c0, %c0_1] : memref<16x128xf32, #tpu.memory_space<vmem>>, vector<16x128xf32>
    %c0_2 = arith.constant 0 : index
    %c0_3 = arith.constant 0 : index
    %4 = vector.load %arg3[%c0_2, %c0_3] : memref<16x128xbf16, #tpu.memory_space<vmem>>, vector<16x128xbf16>
    %c0_4 = arith.constant 0 : index
    %c0_5 = arith.constant 0 : index
    %5 = vector.load %arg4[%c0_4, %c0_5] : memref<128x128xbf16, #tpu.memory_space<vmem>>, vector<128x128xbf16>
    %cst = arith.constant dense<0.000000e+00> : vector<16x128xf32>
    %6 = tpu.matmul %4, %5, %cst {dimension_numbers = #tpu.dot_dimension_numbers<[1], [0], [0], [1], [0, 0, 1, 1], [], []>} : vector<16x128xbf16>, vector<128x128xbf16>, vector<16x128xf32> -> vector<16x128xf32>
    %7 = arith.addf %3, %6 : vector<16x128xf32>
    %c0_6 = arith.constant 0 : index
    %c0_7 = arith.constant 0 : index
    %8 = vector.load %arg7[%c0_6, %c0_7] : memref<16x128xf32, #tpu.memory_space<vmem>>, vector<16x128xf32>
    tpu.vector_store %arg7[%c0_6, %c0_7], %7 {strides = array<i32>} : memref<16x128xf32, #tpu.memory_space<vmem>>, vector<16x128xf32>,
    %c0_i32_8 = arith.constant 0 : i32
    %9 = arith.cmpi eq, %arg2, %c0_i32_8 : i32
    %10 = arith.extui %9 : i1 to i32
    %c0_i32_9 = arith.constant 0 : i32
    %11 = arith.cmpi ne, %10, %c0_i32_9 : i32
    scf.if %11 {
      %c0_10 = arith.constant 0 : index
      %c0_11 = arith.constant 0 : index
      %12 = vector.load %arg7[%c0_10, %c0_11] : memref<16x128xf32, #tpu.memory_space<vmem>>, vector<16x128xf32>
      %c0_12 = arith.constant 0 : index
      %c0_13 = arith.constant 0 : index
      %13 = vector.load %arg5[%c0_12, %c0_13] : memref<1x128xf32, #tpu.memory_space<vmem>>, vector<1x128xf32>
      %14 = vector.broadcast %13 : vector<1x128xf32> to vector<16x128xf32>
      %15 = arith.addf %12, %14 : vector<16x128xf32>
      %c0_14 = arith.constant 0 : index
      %c0_15 = arith.constant 0 : index
      %16 = vector.load %arg6[%c0_14, %c0_15] : memref<16x128xf32, #tpu.memory_space<vmem>>, vector<16x128xf32>
      tpu.vector_store %arg6[%c0_14, %c0_15], %15 {strides = array<i32>} : memref<16x128xf32, #tpu.memory_space<vmem>>, vector<16x128xf32>,
    } else {
    }
    return
  }
  func.func @transform_0(%arg0: i32, %arg1: i32, %arg2: i32) -> (i32, i32) {
    %c0_i32 = arith.constant 0 : i32
    return %arg0, %arg2 : i32, i32
  }
  func.func @transform_1(%arg0: i32, %arg1: i32, %arg2: i32) -> (i32, i32) {
    %c0_i32 = arith.constant 0 : i32
    return %arg2, %arg1 : i32, i32
  }
  func.func @transform_2(%arg0: i32, %arg1: i32, %arg2: i32) -> (i32, i32) {
    %c0_i32 = arith.constant 0 : i32
    %c0_i32_0 = arith.constant 0 : i32
    return %c0_i32, %arg1 : i32, i32
  }
  func.func @transform_3(%arg0: i32, %arg1: i32, %arg2: i32) -> (i32, i32) {
    %c0_i32 = arith.constant 0 : i32
    return %arg0, %arg1 : i32, i32
  }
}

</mosaic_0001>

<bundles_post_ra>
// kernel: interpretable_transformer_forward.11
= control target key start
LH: loop header
LB: loop body
LE: loop exit
PB: predicated region body
PF: predicated region fallthrough
CT: control target
= control target key end

     0   :  { %s235_s1 = inlined_call_operand.vmem [shape: bf16[128,128], index: 1, kind: input, shape index: {}]   ;;  %s236_s2 = inlined_call_operand.vmem [shape: f32[1,128], index: 2, kind: input, shape index: {}]   ;;  %s237_s0 = inlined_call_operand.vmem [shape: bf16[16,128], index: 0, kind: input, shape index: {}]   ;;  %s238_s3 = inlined_call_operand.vmem [shape: bf16[16,128], index: 3, kind: output, shape index: {}]  }
   0x1   :  { %v175_v0 = vld [vmem:[%s235_s1 + $0x38] sm:$0xff]  ;;  %v174_v1 = vld [vmem:[%s235_s1 + $0x30] sm:$0xff]  ;;  %v173_v2 = vld [vmem:[%s235_s1 + $0x28] sm:$0xff] }
   0x2   :  { %94 = vmatpush.bf16.msra.mxu0 %v175_v0  ;;  %v172_v3 = vld [vmem:[%s235_s1 + $0x20] sm:$0xff]  ;;  %v171_v4 = vld [vmem:[%s235_s1 + $0x18] sm:$0xff]  ;;  %v170_v5 = vld [vmem:[%s235_s1 + $0x10] sm:$0xff] }
   0x3   :  { %v169_v6 = vld [vmem:[%s235_s1 + $0x8] sm:$0xff]  ;;  %v168_v7 = vld [vmem:[%s235_s1] sm:$0xff] }
   0x4   :  { %v167_v8 = vld [vmem:[%s237_s0] sm:$0xff] }
   0x5   :  { %v181_v10 = vld [vmem:[%s236_s2] ss:$0 sm:$0xff] }
   0x6   :  { %95 = vmatpush.bf16.msra.mxu0 %v174_v1 }
   0xa   :  { %96 = vmatpush.bf16.msra.mxu0 %v173_v2 }
   0xe   :  { %97 = vmatpush.bf16.msra.mxu0 %v172_v3 }
  0x12   :  { %98 = vmatpush.bf16.msra.mxu0 %v171_v4 }
  0x16   :  { %99 = vmatpush.bf16.msra.mxu0 %v170_v5 }
  0x1a   :  { %100 = vmatpush.bf16.msra.mxu0 %v169_v6 }
  0x1e   :  { %101 = vmatpush.bf16.msra.mxu0 %v168_v7 }
  0x21   :  { %102 = vmatmul.bf16.vlgmr.msra.gmra.mxu0 %v167_v8 }
  0x9e   :  { %v103_v9 = vpop.f32.mrf.mxu0 }
  0x9f   :  { %v121_v12 = vadd.f32 %v181_v10, %v103_v9 }
  0xa6   :  { %v105_v11 = vpop.f32.mrf.mxu0 }
  0xa7   :  { %v122_v13 = vadd.f32 %v181_v10, %v105_v11 }
  0xa9   :  { %v179_v14 = vpack.c.bf16 %v122_v13, %v121_v12 }
  0xab   :  { %180 = vst [vmem:[%s238_s3] sm:$0xff] %v179_v14  }

// kernel: interpretable_transformer_forward.12
= control target key start
LH: loop header
LB: loop body
LE: loop exit
PB: predicated region body
PF: predicated region fallthrough
CT: control target
= control target key end

     0   :  { %s634_s12 = smov 0   ;;  %s636_s13 = smov 0   ;;  %s699_s0 = inlined_call_operand.vmem [shape: bf16[2,3,4,8,8], index: 0, kind: input, shape index: {}, may-alias: {0,1,2}]   ;;  %s700_s1 = inlined_call_operand.vmem [shape: bf16[2,3,4,8,8], index: 1, kind: input, shape index: {}, may-alias: {0,1,2}]   ;;  %s701_s2 = inlined_call_operand.vmem [shape: bf16[2,3,4,8,8], index: 2, kind: input, shape index: {}, may-alias: {0,1,2}]   ;;  %s702_s3 = inlined_call_operand.vmem [shape: bf16[2,4,8,8], index: 3, kind: output, shape index: {}]  }
   0x1   :  { %s638_s14 = smov 0   ;;  %s640_s15 = smov 0  }
   0x2   :  { %s642_s16 = smov 0  }
   0x3 LB: > { %s28_s17 = sadd.s32 1, %s604_s14  ;;  %s32_s18 = sadd.s32 1, %s608_s15  ;;  %s612_s16 = sphi %s642_s16, %s13_s16   ;;  %s608_s15 = sphi %s640_s15, %s706_s15   ;;  %s604_s14 = sphi %s638_s14, %s705_s14   ;;  %s600_s13 = sphi %s636_s13, %s704_s13   ;;  %s596_s12 = sphi %s634_s12, %s703_s12  }
   0x4   : > { %p30_p0 = scmp.ge.s32.totalorder %s28_s17, 4  ;;  %p517_p1 = scmp.ge.s32.totalorder %s612_s16, 1 }
   0x5   : > { %p202_p2 = scmp.lt.s32.totalorder %s612_s16, 9 }
   0x6   : > { %s708_s17 = smov (%p30_p0, %s28_s17), 0  ;;  %s710_s18 = smov (!%p30_p0, %s32_s18), %s608_s15 }
   0x7   : > { %p203_p3 = pnand %p517_p1, %p202_p2  ;;  %p34_p4 = scmp.ge.s32.totalorder %s710_s18, 2 }
   0x8   : > { %p256_p5 = scmp.lt.s32.totalorder (!%p203_p3), %s600_s13, 1  ;;  %p258_p6 = scmp.lt.s32.totalorder (!%p203_p3), %s596_s12, 3 }
   0x9   : > { %s712_s18 = smov (%p34_p4, %s710_s18), 0  ;;  %206 = sbr.rel (%p203_p3) target bundleno = 555 (0x22b), region = 32 }
   0xe   : > { %s714_s13 = smov (!%p256_p5, %s600_s13), 1  ;;  %s716_s12 = smov (!%p258_p6, %s596_s12), 3  ;;  %vm300_vm0 = vcmask 64512   ;;  %vm349_vm1 = vcmask 1043456   ;;  %vm367_vm6 = vcmask 60416  }
   0xf   : > { %s529_s19 = smul.u32 12, %s714_s13  ;;  %s521_s20 = sshll.u32 %s714_s13, 2 }
  0x10   : > { %s664_s21 = sadd.s32 %s521_s20, %s716_s12 }
  0x11   : > { %s264_s22 = sadd.s32 %s529_s19, %s716_s12  ;;  %s522_s6 = sshll.u32 %s664_s21, 2 }
  0x12   : > { %s518_s23 = sshll.u32 %s264_s22, 2  ;;  %s295_s9 = scalar_lea.vmem %s702_s3, %s522_s6 }
  0x13   : > { %s445_s26 = scalar_lea.vmem %s700_s1, %s518_s23  ;;  %s266_s29 = scalar_lea.vmem %s699_s0, %s518_s23 }
  0x14   : > { %v523_v0 = vld [vmem:[%s445_s26 + $0x10] sm:$0xf]  ;;  %v297_v2 = vld [vmem:[%s266_s29] sm:$0xf]  ;;  %s450_s5 = scalar_lea.vmem %s701_s2, %s518_s23 }
  0x15   : > { %v305_v1 = vsel %vm300_vm0, %v523_v0, 0  ;;  %v524_v11 = vld [vmem:[%s450_s5 + $0x20] sm:$0xf] }
  0x16   : > { %314 = vmatpush.bf16.xpose.msra.mxu0 %v305_v1  ;;  %v351_v12 = vsel %vm349_vm1, %v524_v11, 0 }
  0x17   : > { %360 = vmatpush.bf16.msra.mxu1 %v351_v12 }
  0x1d   : > { %525 = vmatmul.msk.bf16.vlgmr.msra.gmra.mxu0 %vm300_vm0, %v297_v2 }
  0x9a   : > { %v316_v3 = vpop.f32.mrf.mxu0 }
  0x9b   : > { %v320_v4 = vsel %vm300_vm0, %v316_v3, -inf }
  0x9c   : > { %321 = vmax.xlane.f32.xlu0 %v320_v4 }
  0xa2   : > { %v318_v5 = vpop.f32.mrf.mxu0 }
 0x10f   : > { %v322_v6 = vpop.xlane.xlu0 %321 }
 0x110   : > { %v323_v7 = vsub.f32 %v316_v3, %v322_v6 }
 0x112   : > { %v324_v8 = vmul.f32 1.442695, %v323_v7 }
 0x114   : > { %570 = vpow2.f32 %v324_v8 }
 0x11a   : > { %v571_v9 = vpop.eup %570 }
 0x11b   : > { %v326_v10 = vsel %vm300_vm0, %v571_v9, 0.0 }
 0x11c   : > { %327 = vadd.xlane.f32.xlu0 %v326_v10 }
 0x18f   : > { %v328_v13 = vpop.xlane.xlu0 %327 }
 0x190   : > { %572 = vrcp.f32 %v328_v13  ;;  %v340_v17 = vand.u32 2147483648, %v328_v13  ;;  %v338_v19 = vand.u32 2147483647, %v328_v13  ;;  %vm334_vm3 = vweird.f32 %v328_v13 }
 0x192   : > { %v341_v21 = vor.u32 1.1754944e-38, %v340_v17  ;;  %vm339_vm5 = vcmp.eq.f32.partialorder %v338_v19, 8.507059e+37 }
 0x196   : > { %v573_v14 = vpop.eup %572 }
 0x197   : > { %v330_v15 = vmul.f32 %v573_v14, %v328_v13  ;;  %vm335_vm2 = vweird.f32 %v573_v14 }
 0x198   : > { %vm336_vm4 = vmor %vm334_vm3, %vm335_vm2 }
 0x199   : > { %v331_v16 = vsub.f32 1.0, %v330_v15 }
 0x19b   : > { %v332_v18 = vmul.f32 %v573_v14, %v331_v16 }
 0x19d   : > { %v333_v20 = vadd.f32 %v573_v14, %v332_v18 }
 0x19f   : > { %v337_v22 = vsel %vm336_vm4, %v573_v14, %v333_v20 }
 0x1a0   : > { %v342_v23 = vsel %vm339_vm5, %v341_v21, %v337_v22 }
 0x1a1   : > { %v344_v24 = vmul.f32 %v571_v9, %v342_v23 }
 0x1a3   : > { %v345_v25 = vpack.c.bf16 %v344_v24, %v344_v24 }
 0x1a5   : > { %526 = vmatmul.msk.bf16.vlgmr.msra.gmra.mxu1 %vm300_vm0, %v345_v25 }
 0x222   : > { %v362_v26 = vpop.f32.mrf.mxu1 }
 0x223   : > { %v366_v27 = vpack.c.bf16 %v362_v26, %v362_v26 }
 0x225   : > { %368 = vst.msk [vmem:[%s295_s9] sm:$0xf] %vm367_vm6, %v366_v27 }
 0x22a   : > { %v364_v28 = vpop.f32.mrf.mxu1 }
 0x22b PF: > { %s13_s16 = sadd.s32 1, %s612_s16   ;;  %s703_s12 = smov %s604_s14 }
 0x22c   : > { %p10_p7 = scmp.ge.s32.totalorder %s13_s16, 10   ;;  %s704_s13 = smov %s608_s15 }
 0x22d   : > { %s705_s14 = smov %s708_s17  ;;  %s706_s15 = smov %s712_s18 }
 0x22e   :  { %12 = sbr.rel (!%p10_p7) target bundleno = 3 (0x3), region = 68 }

// kernel: interpretable_transformer_forward.13
= control target key start
LH: loop header
LB: loop body
LE: loop exit
PB: predicated region body
PF: predicated region fallthrough
CT: control target
= control target key end

     0   :  { %vm27_vm0 = vcmask 261120   ;;  %v272_v2 = vmov 0.0   ;;  %v273_v28 = vmov 32.0   ;;  %vm205_vm6 = vcmask 257024   ;;  %s362_s1 = inlined_call_operand.vmem [shape: bf16[128,32], index: 1, kind: input, shape index: {}]   ;;  %s363_s0 = inlined_call_operand.vmem [shape: bf16[16,128], index: 0, kind: input, shape index: {}]   ;;  %s364_s2 = inlined_call_operand.vmem [shape: f32[1,32], index: 2, kind: input, shape index: {}]   ;;  %s365_s3 = inlined_call_operand.vmem [shape: bf16[16,32], index: 3, kind: input, shape index: {}]   ;;  %s366_s4 = inlined_call_operand.vmem [shape: f32[1,32], index: 4, kind: input, shape index: {}]   ;;  %s367_s5 = inlined_call_operand.vmem [shape: f32[1,32], index: 5, kind: input, shape index: {}]   ;;  %s368_s6 = inlined_call_operand.vmem [shape: bf16[16,32], index: 6, kind: output, shape index: {}]  }
   0x1   :  { %v256_v0 = vld [vmem:[%s362_s1 + $0x38] sm:$0xff]  ;;  %v255_v1 = vld [vmem:[%s362_s1 + $0x30] sm:$0xff]  ;;  %28 = vst.msk [vmem:[#allocation2] sm:$0xff] %vm27_vm0, %v272_v2  ;;  %v254_v3 = vld [vmem:[%s362_s1 + $0x28] sm:$0xff]  ;;  %266 = vrcp.f32 %v273_v28 }
   0x2   :  { %104 = vmatpush.bf16.msra.mxu0 %v256_v0  ;;  %29 = vst.msk [vmem:[#allocation2 + $0x8] sm:$0xff] %vm27_vm0, %v272_v2  ;;  %v253_v4 = vld [vmem:[%s362_s1 + $0x20] sm:$0xff]  ;;  %v252_v5 = vld [vmem:[%s362_s1 + $0x18] sm:$0xff]  ;;  %v251_v6 = vld [vmem:[%s362_s1 + $0x10] sm:$0xff] }
   0x3   :  { %v250_v7 = vld [vmem:[%s362_s1 + $0x8] sm:$0xff]  ;;  %v249_v8 = vld [vmem:[%s362_s1] sm:$0xff] }
   0x4   :  { %v248_v9 = vld [vmem:[%s363_s0] sm:$0xff] }
   0x5   :  { %v258_v14 = vld [vmem:[%s365_s3] sm:$0xff]  }
   0x6   :  { %105 = vmatpush.bf16.msra.mxu0 %v255_v1  ;;  %v263_v15 = vld [vmem:[%s364_s2] ss:$0 sm:$0xff]  ;;  %v259_v18 = vunpack.c.l.bf16 %v258_v14  ;;  %v260_v23 = vunpack.c.h.bf16 %v258_v14 }
   0x7   :  { %v267_v29 = vpop.eup %266  ;;  %v264_v59 = vld [vmem:[%s366_s4] ss:$0 sm:$0xff] }
   0x8   :  { %v30_v10 = vld [vmem:[#allocation2] sm:$0xff]  ;;  %v147_v30 = vmul.f32 32.0, %v267_v29  ;;  %vm151_vm1 = vweird.f32 %v267_v29 }
   0x9   :  { %v31_v13 = vld [vmem:[#allocation2 + $0x8] sm:$0xff]  ;;  %v265_v62 = vld [vmem:[%s367_s5] ss:$0 sm:$0xff] }
   0xa   :  { %106 = vmatpush.bf16.msra.mxu0 %v254_v3  ;;  %v148_v31 = vsub.f32 1.0, %v147_v30 }
   0xc   :  { %v149_v32 = vmul.f32 %v267_v29, %v148_v31 }
   0xe   :  { %107 = vmatpush.bf16.msra.mxu0 %v253_v4  ;;  %v150_v33 = vadd.f32 %v267_v29, %v149_v32 }
  0x10   :  { %v152_v34 = vsel %vm151_vm1, %v267_v29, %v150_v33 }
  0x12   :  { %108 = vmatpush.bf16.msra.mxu0 %v252_v5 }
  0x16   :  { %109 = vmatpush.bf16.msra.mxu0 %v251_v6 }
  0x1a   :  { %110 = vmatpush.bf16.msra.mxu0 %v250_v7 }
  0x1e   :  { %111 = vmatpush.bf16.msra.mxu0 %v249_v8 }
  0x21   :  { %112 = vmatmul.bf16.vlgmr.msra.gmra.mxu0 %v248_v9 }
  0x9e   :  { %v113_v11 = vpop.f32.mrf.mxu0 }
  0x9f   :  { %v118_v12 = vadd.f32 %v113_v11, %v30_v10 }
  0xa1   :  { %121 = vst.msk [vmem:[#allocation2] sm:$0xff] %vm27_vm0, %v118_v12 }
  0xa6   :  { %v115_v16 = vpop.f32.mrf.mxu0 }
  0xa7   :  { %v119_v17 = vadd.f32 %v115_v16, %v31_v13 }
  0xa8   :  { %v126_v19 = vld [vmem:[#allocation2] sm:$0xff] }
  0xa9   :  { %122 = vst.msk [vmem:[#allocation2 + $0x8] sm:$0xff] %vm27_vm0, %v119_v17  ;;  %v132_v20 = vadd.f32 %v263_v15, %v126_v19 }
  0xab   :  { %v138_v21 = vadd.f32 %v259_v18, %v132_v20 }
  0xad   :  { %v140_v22 = vsel %vm27_vm0, %v138_v21, 0.0 }
  0xae   :  { %141 = vadd.xlane.f32.xlu0 %v140_v22 }
  0xb0   :  { %v127_v24 = vld [vmem:[#allocation2 + $0x8] sm:$0xff] }
  0xb1   :  { %v133_v25 = vadd.f32 %v263_v15, %v127_v24 }
  0xb3   :  { %v139_v26 = vadd.f32 %v260_v23, %v133_v25 }
  0xb5   :  { %v143_v27 = vsel %vm27_vm0, %v139_v26, 0.0 }
  0xb6   :  { %144 = vadd.xlane.f32.xlu0 %v143_v27 }
 0x121   :  { %v142_v35 = vpop.xlane.xlu0 %141 }
 0x122   :  { %v153_v36 = vmul.f32 %v152_v34, %v142_v35 }
 0x124   :  { %v155_v37 = vsub.f32 %v138_v21, %v153_v36 }
 0x126   :  { %v157_v38 = vmul.f32 %v155_v37, %v155_v37 }
 0x128   :  { %v159_v39 = vsel %vm27_vm0, %v157_v38, 0.0 }
 0x129   :  { %160 = vadd.xlane.f32.xlu1 %v159_v39  ;;  %v145_v40 = vpop.xlane.xlu0 %144 }
 0x12a   :  { %v154_v41 = vmul.f32 %v152_v34, %v145_v40 }
 0x12c   :  { %v156_v42 = vsub.f32 %v139_v26, %v154_v41 }
 0x12e   :  { %v158_v43 = vmul.f32 %v156_v42, %v156_v42 }
 0x130   :  { %v162_v44 = vsel %vm27_vm0, %v158_v43, 0.0 }
 0x131   :  { %163 = vadd.xlane.f32.xlu1 %v162_v44 }
 0x19c   :  { %v161_v45 = vpop.xlane.xlu1 %160 }
 0x19d   :  { %v165_v46 = vmul.f32 %v161_v45, %v152_v34 }
 0x19f   :  { %v167_v47 = vadd.f32 1e-05, %v165_v46 }
 0x1a1   :  { %268 = vrsqrt.f32 %v167_v47  ;;  %vm175_vm3 = vweird.f32 %v167_v47 }
 0x1a4   :  { %v164_v48 = vpop.xlane.xlu1 %163 }
 0x1a5   :  { %v166_v49 = vmul.f32 %v164_v48, %v152_v34 }
 0x1a7   :  { %v269_v50 = vpop.eup %268  ;;  %v168_v51 = vadd.f32 1e-05, %v166_v49 }
 0x1a8   :  { %v170_v52 = vmul.f32 %v269_v50, %v167_v47  ;;  %vm176_vm2 = vweird.f32 %v269_v50 }
 0x1a9   :  { %270 = vrsqrt.f32 %v168_v51  ;;  %vm177_vm4 = vmor %vm175_vm3, %vm176_vm2  ;;  %vm185_vm7 = vweird.f32 %v168_v51 }
 0x1aa   :  { %v171_v53 = vmul.f32 %v269_v50, %v170_v52 }
 0x1ac   :  { %v172_v54 = vmul.f32 0.5, %v171_v53 }
 0x1ae   :  { %v173_v55 = vsub.f32 1.5, %v172_v54 }
 0x1af   :  { %v271_v56 = vpop.eup %270 }
 0x1b0   :  { %v174_v57 = vmul.f32 %v269_v50, %v173_v55  ;;  %v180_v58 = vmul.f32 %v271_v56, %v168_v51  ;;  %vm186_vm5 = vweird.f32 %v271_v56 }
 0x1b1   :  { %vm187_vm8 = vmor %vm185_vm7, %vm186_vm5 }
 0x1b2   :  { %v178_v60 = vsel %vm177_vm4, %v269_v50, %v174_v57  ;;  %v181_v61 = vmul.f32 %v271_v56, %v180_v58 }
 0x1b3   :  { %v189_v63 = vmul.f32 %v178_v60, %v155_v37 }
 0x1b4   :  { %v182_v0 = vmul.f32 0.5, %v181_v61 }
 0x1b5   :  { %v195_v1 = vmul.f32 %v264_v59, %v189_v63 }
 0x1b6   :  { %v183_v2 = vsub.f32 1.5, %v182_v0 }
 0x1b7   :  { %v201_v3 = vadd.f32 %v265_v62, %v195_v1 }
 0x1b8   :  { %v184_v4 = vmul.f32 %v271_v56, %v183_v2 }
 0x1b9   :  { %v203_v5 = vpack.c.bf16 %v201_v3, %v201_v3 }
 0x1ba   :  { %v188_v6 = vsel %vm187_vm8, %v271_v56, %v184_v4 }
 0x1bb   :  { %206 = vst.msk [vmem:[%s368_s6] sm:$0xf] %vm205_vm6, %v203_v5  ;;  %v190_v7 = vmul.f32 %v188_v6, %v156_v42 }
 0x1bd   :  { %v196_v8 = vmul.f32 %v264_v59, %v190_v7 }
 0x1bf   :  { %v202_v9 = vadd.f32 %v265_v62, %v196_v8 }
 0x1c1   :  { %v204_v10 = vpack.c.bf16 %v202_v9, %v202_v9 }
 0x1c3   :  { %207 = vst.msk [vmem:[%s368_s6 + $0x4] sm:$0xf] %vm205_vm6, %v204_v10 }

// kernel: interpretable_transformer_forward.14
= control target key start
LH: loop header
LB: loop body
LE: loop exit
PB: predicated region body
PF: predicated region fallthrough
CT: control target
= control target key end

     0   :  { %s257_s1 = inlined_call_operand.vmem [shape: bf16[128,128], index: 1, kind: input, shape index: {}]   ;;  %s258_s2 = inlined_call_operand.vmem [shape: f32[1,128], index: 2, kind: input, shape index: {}]   ;;  %s259_s0 = inlined_call_operand.vmem [shape: bf16[16,128], index: 0, kind: input, shape index: {}]   ;;  %s260_s3 = inlined_call_operand.vmem [shape: bf16[16,128], index: 3, kind: output, shape index: {}]  }
   0x1   :  { %v193_v0 = vld [vmem:[%s257_s1 + $0x38] sm:$0xff]  ;;  %v192_v1 = vld [vmem:[%s257_s1 + $0x30] sm:$0xff]  ;;  %v191_v2 = vld [vmem:[%s257_s1 + $0x28] sm:$0xff] }
   0x2   :  { %94 = vmatpush.bf16.msra.mxu0 %v193_v0  ;;  %v190_v3 = vld [vmem:[%s257_s1 + $0x20] sm:$0xff]  ;;  %v189_v4 = vld [vmem:[%s257_s1 + $0x18] sm:$0xff]  ;;  %v188_v5 = vld [vmem:[%s257_s1 + $0x10] sm:$0xff] }
   0x3   :  { %v187_v6 = vld [vmem:[%s257_s1 + $0x8] sm:$0xff]  ;;  %v186_v7 = vld [vmem:[%s257_s1] sm:$0xff] }
   0x4   :  { %v185_v8 = vld [vmem:[%s259_s0] sm:$0xff] }
   0x5   :  { %v199_v9 = vld [vmem:[%s258_s2] ss:$0 sm:$0xff] }
   0x6   :  { %95 = vmatpush.bf16.msra.mxu0 %v192_v1 }
   0xa   :  { %96 = vmatpush.bf16.msra.mxu0 %v191_v2 }
   0xe   :  { %97 = vmatpush.bf16.msra.mxu0 %v190_v3 }
  0x12   :  { %98 = vmatpush.bf16.msra.mxu0 %v189_v4 }
  0x16   :  { %99 = vmatpush.bf16.msra.mxu0 %v188_v5 }
  0x1a   :  { %100 = vmatpush.bf16.msra.mxu0 %v187_v6 }
  0x1e   :  { %101 = vmatpush.bf16.msra.mxu0 %v186_v7 }
  0x21   :  { %102 = vmatmul.bf16.vlgmr.msra.gmra.mxu0 %v185_v8 }
  0x9e   :  { %v103_v10 = vpop.f32.mrf.mxu0 }
  0x9f   :  { %v121_v11 = vadd.f32 %v199_v9, %v103_v10 }
  0xa1   :  { %v123_v12 = vmul.f32 %v121_v11, %v121_v11 }
  0xa3   :  { %v125_v13 = vmul.f32 %v123_v12, %v121_v11 }
  0xa5   :  { %v127_v14 = vmul.f32 0.044715, %v125_v13 }
  0xa6   :  { %v105_v15 = vpop.f32.mrf.mxu0 }
  0xa7   :  { %v129_v16 = vadd.f32 %v127_v14, %v121_v11  ;;  %v122_v17 = vadd.f32 %v199_v9, %v105_v15 }
  0xa9   :  { %v131_v18 = vmul.f32 0.7978846, %v129_v16  ;;  %v124_v19 = vmul.f32 %v122_v17, %v122_v17 }
  0xab   :  { %v126_v20 = vmul.f32 %v124_v19, %v122_v17  ;;  %200 = vtanh.f32 %v131_v18 }
  0xad   :  { %v128_v21 = vmul.f32 0.044715, %v126_v20 }
  0xaf   :  { %v130_v22 = vadd.f32 %v128_v21, %v122_v17 }
  0xb1   :  { %v132_v23 = vmul.f32 0.7978846, %v130_v22  ;;  %v201_v24 = vpop.eup %200 }
  0xb2   :  { %v135_v25 = vadd.f32 1.0, %v201_v24 }
  0xb3   :  { %202 = vtanh.f32 %v132_v23 }
  0xb4   :  { %v137_v27 = vmul.f32 0.5, %v135_v25 }
  0xb6   :  { %v139_v30 = vmul.f32 %v137_v27, %v121_v11 }
  0xb9   :  { %v203_v26 = vpop.eup %202 }
  0xba   :  { %v136_v28 = vadd.f32 1.0, %v203_v26 }
  0xbc   :  { %v138_v29 = vmul.f32 0.5, %v136_v28 }
  0xbe   :  { %v140_v31 = vmul.f32 %v138_v29, %v122_v17 }
  0xc0   :  { %v197_v32 = vpack.c.bf16 %v140_v31, %v139_v30 }
  0xc2   :  { %198 = vst [vmem:[%s260_s3] sm:$0xff] %v197_v32  }

// kernel: interpretable_transformer_forward.21
= control target key start
LH: loop header
LB: loop body
LE: loop exit
PB: predicated region body
PF: predicated region fallthrough
CT: control target
= control target key end

     0   :  { %s231_s1 = inlined_call_operand.vmem [shape: bf16[128,128], index: 1, kind: input, shape index: {}]   ;;  %s232_s2 = inlined_call_operand.vmem [shape: f32[1,128], index: 2, kind: input, shape index: {}]   ;;  %s233_s0 = inlined_call_operand.vmem [shape: bf16[16,128], index: 0, kind: input, shape index: {}]   ;;  %s234_s3 = inlined_call_operand.vmem [shape: f32[16,128], index: 3, kind: output, shape index: {}]  }
   0x1   :  { %v173_v0 = vld [vmem:[%s231_s1 + $0x38] sm:$0xff]  ;;  %v172_v1 = vld [vmem:[%s231_s1 + $0x30] sm:$0xff]  ;;  %v171_v2 = vld [vmem:[%s231_s1 + $0x28] sm:$0xff] }
   0x2   :  { %94 = vmatpush.bf16.msra.mxu0 %v173_v0  ;;  %v170_v3 = vld [vmem:[%s231_s1 + $0x20] sm:$0xff]  ;;  %v169_v4 = vld [vmem:[%s231_s1 + $0x18] sm:$0xff]  ;;  %v168_v5 = vld [vmem:[%s231_s1 + $0x10] sm:$0xff] }
   0x3   :  { %v167_v6 = vld [vmem:[%s231_s1 + $0x8] sm:$0xff]  ;;  %v166_v7 = vld [vmem:[%s231_s1] sm:$0xff] }
   0x4   :  { %v165_v8 = vld [vmem:[%s233_s0] sm:$0xff] }
   0x5   :  { %v174_v9 = vld [vmem:[%s232_s2] ss:$0 sm:$0xff] }
   0x6   :  { %95 = vmatpush.bf16.msra.mxu0 %v172_v1 }
   0xa   :  { %96 = vmatpush.bf16.msra.mxu0 %v171_v2 }
   0xe   :  { %97 = vmatpush.bf16.msra.mxu0 %v170_v3 }
  0x12   :  { %98 = vmatpush.bf16.msra.mxu0 %v169_v4 }
  0x16   :  { %99 = vmatpush.bf16.msra.mxu0 %v168_v5 }
  0x1a   :  { %100 = vmatpush.bf16.msra.mxu0 %v167_v6 }
  0x1e   :  { %101 = vmatpush.bf16.msra.mxu0 %v166_v7 }
  0x21   :  { %102 = vmatmul.bf16.vlgmr.msra.gmra.mxu0 %v165_v8 }
  0x9e   :  { %v103_v10 = vpop.f32.mrf.mxu0 }
  0x9f   :  { %v121_v11 = vadd.f32 %v174_v9, %v103_v10 }
  0xa1   :  { %123 = vst [vmem:[%s234_s3] sm:$0xff] %v121_v11 }
  0xa6   :  { %v105_v12 = vpop.f32.mrf.mxu0 }
  0xa7   :  { %v122_v13 = vadd.f32 %v174_v9, %v105_v12 }
  0xa9   :  { %124 = vst [vmem:[%s234_s3 + $0x8] sm:$0xff] %v122_v13 }

</bundles_post_ra>
